<compile_context>
chip_gen: v6e
topology: v6e:2x2x1
jax: 0.10.0
libtpu: 0.0.40
codegen_flags: <defaults>
</compile_context>

<pallas_src>
import jax
import jax.numpy as jnp
from jax import lax
from jax.experimental import pallas as pl
from jax.experimental.pallas import tpu as pltpu


def _round_up(x: int, m: int) -> int:
    return (x + m - 1) // m * m


def _feat2sim_kernel(fi_ref, fj_ref, ti_ref, tj_ref, sim_ref, label_ref):
    # 'nt' matmul: contract the last (D / lane) axis of both operands directly
    # on the MXU; avoids transposing the (tile, D) block before the MXU push.
    sim_ref[...] = lax.dot_general(
        fi_ref[...],
        fj_ref[...],
        dimension_numbers=(((1,), (1,)), ((), ())),
        preferred_element_type=jnp.float32,
    )
    # Pairwise label equality: (TM, 1) == (1, TN) broadcast compare on the VPU.
    label_ref[...] = (ti_ref[...] == tj_ref[...]).astype(jnp.int8)


def _feat2sim_kernel_ktiled(fi_ref, fj_ref, ti_ref, tj_ref, sim_ref, label_ref):
    # Large-D path: D is tiled along grid axis k (innermost, "arbitrary").
    # The f32 sim output block stays resident in VMEM across k (its index_map
    # only depends on (i, j)), so we accumulate into it directly.
    k = pl.program_id(2)

    @pl.when(k == 0)
    def _():
        sim_ref[...] = jnp.zeros_like(sim_ref)
        label_ref[...] = (ti_ref[...] == tj_ref[...]).astype(jnp.int8)

    sim_ref[...] += lax.dot_general(
        fi_ref[...],
        fj_ref[...],
        dimension_numbers=(((1,), (1,)), ((), ())),
        preferred_element_type=jnp.float32,
    )


def _select_tiles(n: int, d: int):
    # TN: lane-dense stores -> multiple of 128, capped at 512 (HBM-roofline
    # sweet spot in the writeback-bound small-D regime). For tiny N use the
    # full dim (block_shape == array dim is always legal).
    tn = min(512, (n // 128) * 128) if n >= 128 else n
    # TM: the i-block is resident across the inner j loop, so fj re-streaming
    # scales as N^2*D/TM -> grow it only in the big-D / big-N regime; otherwise
    # keep 256 so grid[0] >= 2 for mid-size N (v7x megacore sharding).
    tm_cap = 512 if (d > 512 and n >= 1024) else 256
    tm = min(tm_cap, (n // 8) * 8) if n >= 8 else n
    return tm, tn


def _pick_tk(d: int) -> int:
    for tk in (2048, 1024, 512, 256, 128):
        if d % tk == 0:
            return tk
    return 512  # caller zero-pads D up to a multiple of this


def feat2sim(feats: jax.Array, targets: jax.Array, *,
             k_tile_threshold_bytes: int = 12 << 20):
    """Pallas equivalent of BaseLoss.feat2sim.

    feats:   (N, D) float32 or bfloat16
    targets: (N,)   integer labels
    returns: (sim (N, N) float32, label (N, N) int8 with 0/1 values)
    """
    n, d = feats.shape
    itemsize = jnp.dtype(feats.dtype).itemsize

    tm, tn = _select_tiles(n, d)
    grid_i = pl.cdiv(n, tm)
    grid_j = pl.cdiv(n, tn)

    t_col = targets.reshape(n, 1).astype(jnp.int32)  # (N, 1) row labels
    t_row = targets.reshape(1, n).astype(jnp.int32)  # (1, N) col labels

    out_shapes = (
        jax.ShapeDtypeStruct((n, n), jnp.float32),
        jax.ShapeDtypeStruct((n, n), jnp.int8),
    )
    cost = pl.CostEstimate(
        flops=2 * n * n * d,
        transcendentals=0,
        bytes_accessed=n * d * itemsize + n * n * (4 + 1) + 2 * n * 4,
    )

    # Double-buffered full-D fi/fj input streams.
    full_d_stream = 2 * (tm + tn) * d * itemsize

    if full_d_stream <= k_tile_threshold_bytes:
        # ---------- Fast path: full D per grid step (small / moderate D) ----
        need = full_d_stream + 2 * (tm + tn) * 4 + 2 * tm * tn * (4 + 1)
        vmem_limit = int(min(max(need + (8 << 20), 32 << 20), 64 << 20))

        sim, label = pl.pallas_call(
            _feat2sim_kernel,
            out_shape=out_shapes,
            grid=(grid_i, grid_j),
            in_specs=[
                # i-block: index_map independent of j (inner axis) -> resident,
                # not re-DMA'd across the inner loop.
                pl.BlockSpec((tm, d), lambda i, j: (i, 0)),
                pl.BlockSpec((tn, d), lambda i, j: (j, 0)),
                pl.BlockSpec((tm, 1), lambda i, j: (i, 0)),
                pl.BlockSpec((1, tn), lambda i, j: (0, j)),
            ],
            out_specs=(
                pl.BlockSpec((tm, tn), lambda i, j: (i, j)),
                pl.BlockSpec((tm, tn), lambda i, j: (i, j)),
            ),
            compiler_params=pltpu.CompilerParams(
                dimension_semantics=("parallel", "parallel"),
                vmem_limit_bytes=vmem_limit,
            ),
            cost_estimate=cost,
        )(feats, feats, t_col, t_row)
        return sim, label

    # ---------- Large-D path: K(=D)-tiled accumulator --------------------
    tk = _pick_tk(d)
    d_pad = _round_up(d, tk)
    if d_pad != d:
        # Zero-padding along D is safe: zeros contribute nothing to the dot.
        feats = jnp.pad(feats, ((0, 0), (0, d_pad - d)))
    grid_k = d_pad // tk

    need = 2 * (tm + tn) * tk * itemsize + 2 * (tm + tn) * 4 + 2 * tm * tn * (4 + 1)
    vmem_limit = int(min(max(need + (8 << 20), 32 << 20), 64 << 20))

    sim, label = pl.pallas_call(
        _feat2sim_kernel_ktiled,
        out_shape=out_shapes,
        grid=(grid_i, grid_j, grid_k),
        in_specs=[
            pl.BlockSpec((tm, tk), lambda i, j, k: (i, k)),
            pl.BlockSpec((tn, tk), lambda i, j, k: (j, k)),
            pl.BlockSpec((tm, 1), lambda i, j, k: (i, 0)),
            pl.BlockSpec((1, tn), lambda i, j, k: (0, j)),
        ],
        out_specs=(
            # (i, j) only: both output blocks stay resident across k and are
            # written back to HBM once (accumulator pattern).
            pl.BlockSpec((tm, tn), lambda i, j, k: (i, j)),
            pl.BlockSpec((tm, tn), lambda i, j, k: (i, j)),
        ),
        compiler_params=pltpu.CompilerParams(
            dimension_semantics=("parallel", "parallel", "arbitrary"),
            vmem_limit_bytes=vmem_limit,
        ),
        cost_estimate=cost,
    )(feats, feats, t_col, t_row)
    return sim, label


# TODO(synk): BaseLoss._preprocess()/forward() are @abstractmethod (no body) and
# param_groups() is optimizer plumbing -- nothing to translate. If a concrete
# subclass's loss reduction were available, it should be fused into this kernel
# so the (N, N) sim/label arrays never hit HBM (the dominant cost at small D).


if __name__ == "__main__":
    key = jax.random.PRNGKey(0)
    k1, k2, k3, k4 = jax.random.split(key, 4)

    # Primary small-shape run (fast path): batch of 128 embeddings, dim 32.
    N, D = 128, 32
    feats = jax.random.normal(k1, (N, D), dtype=jnp.float32)
    targets = jax.random.randint(k2, (N,), 0, 4, dtype=jnp.int32)

    sim, label = feat2sim(feats, targets)
    jax.block_until_ready((sim, label))

    sim_ref = feats @ feats.T
    label_ref = (targets[:, None] == targets[None, :]).astype(jnp.int8)
    assert sim.shape == (N, N) and label.shape == (N, N)
    assert jnp.allclose(sim, sim_ref, atol=1e-4, rtol=1e-4)
    assert jnp.array_equal(label, label_ref)

    # Ragged N (exercises masked edge blocks, no pad/slice round-trip) and the
    # K-tiled accumulator path (threshold forced down -> tk=128, 3 k-steps).
    N2, D2 = 200, 384
    feats2 = jax.random.normal(k3, (N2, D2), dtype=jnp.float32)
    targets2 = jax.random.randint(k4, (N2,), 0, 7, dtype=jnp.int32)

    sim2, label2 = feat2sim(feats2, targets2, k_tile_threshold_bytes=1)
    jax.block_until_ready((sim2, label2))

    sim2_ref = feats2 @ feats2.T
    label2_ref = (targets2[:, None] == targets2[None, :]).astype(jnp.int8)
    assert sim2.shape == (N2, N2) and label2.shape == (N2, N2)
    assert jnp.allclose(sim2, sim2_ref, atol=1e-3, rtol=1e-3)
    assert jnp.array_equal(label2, label2_ref)

    print("KERNEL_OK")
</pallas_src>

<mosaic_0001>
module attributes {stable_mosaic.version = 11 : i64} {
  func.func @_feat2sim_kernel(%arg0: i32, %arg1: i32, %arg2: memref<128x32xf32, #tpu.memory_space<vmem>>, %arg3: memref<128x32xf32, #tpu.memory_space<vmem>>, %arg4: memref<128x1xi32, #tpu.memory_space<vmem>>, %arg5: memref<1x128xi32, #tpu.memory_space<vmem>>, %arg6: memref<128x128xf32, #tpu.memory_space<vmem>>, %arg7: memref<128x128xi8, #tpu.memory_space<vmem>>) attributes {dimension_semantics = [#tpu.dimension_semantics<parallel>, #tpu.dimension_semantics<parallel>], iteration_bounds = array<i64: 1, 1>, scalar_prefetch = 0 : i64, scratch_operands = 0 : i64, tpu.core_type = #tpu.core_type<tc>, window_params = [{transform_indices = @transform_0, window_bounds = array<i64: 128, 32>}, {transform_indices = @transform_1, window_bounds = array<i64: 128, 32>}, {transform_indices = @transform_2, window_bounds = array<i64: 128, 1>}, {transform_indices = @transform_3, window_bounds = array<i64: 1, 128>}, {transform_indices = @transform_4, window_bounds = array<i64: 128, 128>}, {transform_indices = @transform_5, window_bounds = array<i64: 128, 128>}]} {
    %c0 = arith.constant 0 : index
    %c0_0 = arith.constant 0 : index
    %0 = vector.load %arg2[%c0, %c0_0] : memref<128x32xf32, #tpu.memory_space<vmem>>, vector<128x32xf32>
    %c0_1 = arith.constant 0 : index
    %c0_2 = arith.constant 0 : index
    %1 = vector.load %arg3[%c0_1, %c0_2] : memref<128x32xf32, #tpu.memory_space<vmem>>, vector<128x32xf32>
    %cst = arith.constant dense<0.000000e+00> : vector<128x128xf32>
    %2 = tpu.matmul %0, %1, %cst {dimension_numbers = #tpu.dot_dimension_numbers<[1], [1], [0], [0], [0, 0, 1, 0], [], []>} : vector<128x32xf32>, vector<128x32xf32>, vector<128x128xf32> -> vector<128x128xf32>
    %c0_3 = arith.constant 0 : index
    %c0_4 = arith.constant 0 : index
    %3 = vector.load %arg6[%c0_3, %c0_4] : memref<128x128xf32, #tpu.memory_space<vmem>>, vector<128x128xf32>
    tpu.vector_store %arg6[%c0_3, %c0_4], %2 {strides = array<i32>} : memref<128x128xf32, #tpu.memory_space<vmem>>, vector<128x128xf32>,
    %c0_5 = arith.constant 0 : index
    %c0_6 = arith.constant 0 : index
    %4 = vector.load %arg4[%c0_5, %c0_6] : memref<128x1xi32, #tpu.memory_space<vmem>>, vector<128x1xi32>
    %c0_7 = arith.constant 0 : index
    %c0_8 = arith.constant 0 : index
    %5 = vector.load %arg5[%c0_7, %c0_8] : memref<1x128xi32, #tpu.memory_space<vmem>>, vector<1x128xi32>
    %6 = vector.broadcast %4 : vector<128x1xi32> to vector<128x128xi32>
    %7 = vector.broadcast %5 : vector<1x128xi32> to vector<128x128xi32>
    %8 = arith.cmpi eq, %6, %7 : vector<128x128xi32>
    %9 = arith.extui %8 : vector<128x128xi1> to vector<128x128xi8>
    %c0_9 = arith.constant 0 : index
    %c0_10 = arith.constant 0 : index
    %10 = vector.load %arg7[%c0_9, %c0_10] : memref<128x128xi8, #tpu.memory_space<vmem>>, vector<128x128xi8>
    tpu.vector_store %arg7[%c0_9, %c0_10], %9 {strides = array<i32>} : memref<128x128xi8, #tpu.memory_space<vmem>>, vector<128x128xi8>,
    return
  }
  func.func @transform_0(%arg0: i32, %arg1: i32) -> (i32, i32) {
    %c0_i32 = arith.constant 0 : i32
    %c0_i32_0 = arith.constant 0 : i32
    return %arg0, %c0_i32 : i32, i32
  }
  func.func @transform_1(%arg0: i32, %arg1: i32) -> (i32, i32) {
    %c0_i32 = arith.constant 0 : i32
    %c0_i32_0 = arith.constant 0 : i32
    return %arg1, %c0_i32 : i32, i32
  }
  func.func @transform_2(%arg0: i32, %arg1: i32) -> (i32, i32) {
    %c0_i32 = arith.constant 0 : i32
    %c0_i32_0 = arith.constant 0 : i32
    return %arg0, %c0_i32 : i32, i32
  }
  func.func @transform_3(%arg0: i32, %arg1: i32) -> (i32, i32) {
    %c0_i32 = arith.constant 0 : i32
    %c0_i32_0 = arith.constant 0 : i32
    return %c0_i32, %arg1 : i32, i32
  }
  func.func @transform_4(%arg0: i32, %arg1: i32) -> (i32, i32) {
    %c0_i32 = arith.constant 0 : i32
    return %arg0, %arg1 : i32, i32
  }
  func.func @transform_5(%arg0: i32, %arg1: i32) -> (i32, i32) {
    %c0_i32 = arith.constant 0 : i32
    return %arg0, %arg1 : i32, i32
  }
}

</mosaic_0001>

<bundles_post_ra>
// kernel: tpu_custom_call.1
= control target key start
LH: loop header
LB: loop body
LE: loop exit
PB: predicated region body
PF: predicated region fallthrough
CT: control target
= control target key end

     0   :  { %11 = vsyncpa [#allocation3], 0  ;;  %vm55_vm0 = vcmask 261120   ;;  %v654_v3 = vmov 0   ;;  %s934_s0 = inlined_call_operand.vmem [shape: f32[128,32], index: 0, kind: input, shape index: {}]   ;;  %s935_s1 = inlined_call_operand.vmem [shape: f32[128,32], index: 1, kind: input, shape index: {}]   ;;  %s936_s2 = inlined_call_operand.vmem [shape: s32[128,1], index: 2, kind: input, shape index: {}]   ;;  %s937_s3 = inlined_call_operand.vmem [shape: s32[1,128], index: 3, kind: input, shape index: {}]   ;;  %s938_s4 = inlined_call_operand.hbm [shape: f32[128,128], index: 4, kind: output, shape index: {0}]   ;;  %s939_s5 = inlined_call_operand.hbm [shape: s8[128,128], index: 5, kind: output, shape index: {1}]  }
   0x1   :  { %v54_v0 = vld [vmem:[%s935_s1 + $0x78] sm:$0xff]  ;;  %v53_v1 = vld [vmem:[%s935_s1 + $0x70] sm:$0xff]  ;;  %v52_v2 = vld [vmem:[%s935_s1 + $0x68] sm:$0xff]  ;;  %609 = vset.pattern.permute.xlu1 %v654_v3  ;;  %608 = vset.pattern.permute.xlu0 %v654_v3 }
   0x2   :  { %515 = vmatprep.subr.msk.mxu0 %vm55_vm0, %v54_v0  ;;  %571 = vmatprep.subr.msk.mxu1 %vm55_vm0, %v54_v0  ;;  %v23_v4 = vld [vmem:[%s934_s0] sm:$0xff]  ;;  %v315_v7 = vld [vmem:[%s936_s2 + $0x10] sm:$0xff]  ;;  %v50_v9 = vld [vmem:[%s935_s1 + $0x58] sm:$0xff] }
   0x3   :  { %516 = vmatpush3.xpose.msk.msra.mxu0 %vm55_vm0, %v54_v0  ;;  %587 = vmatpush3.xpose.msk.msra.mxu1 %vm55_vm0, %v54_v0  ;;  %v31_v5 = vld [vmem:[%s934_s0 + $0x40] sm:$0xff]  ;;  %v316_v10 = vld [vmem:[%s936_s2 + $0x18] sm:$0xff]  ;;  %v314_v11 = vld [vmem:[%s936_s2 + $0x8] sm:$0xff] }
   0x4   :  { %517 = vmatprep.subr.msk.mxu0 %vm55_vm0, %v53_v1  ;;  %572 = vmatprep.subr.msk.mxu1 %vm55_vm0, %v53_v1  ;;  %v51_v6 = vld [vmem:[%s935_s1 + $0x60] sm:$0xff]  ;;  %v49_v12 = vld [vmem:[%s935_s1 + $0x50] sm:$0xff] }
   0x5   :  { %547 = vmatprep.mubr.msk.f32.mxu0 %vm55_vm0, %v23_v4  ;;  %559 = vmatprep.mubr.msk.f32.mxu1 %vm55_vm0, %v31_v5  ;;  %v313_v8 = vld [vmem:[%s936_s2] sm:$0xff] }
   0x6   :  { %337 = vperm.xlu1 %609, %v315_v7   ;;  %331 = vperm.xlu0 %608, %v313_v8  }
   0x7   :  { %518 = vmatpush3.xpose.msk.msra.mxu0 %vm55_vm0, %v53_v1  ;;  %588 = vmatpush3.xpose.msk.msra.mxu1 %vm55_vm0, %v53_v1 }
   0x8   :  { %519 = vmatprep.subr.msk.mxu0 %vm55_vm0, %v52_v2  ;;  %573 = vmatprep.subr.msk.mxu1 %vm55_vm0, %v52_v2 }
   0xa   :  { %340 = vperm.xlu1 %609, %v316_v10   ;;  %334 = vperm.xlu0 %608, %v314_v11  }
   0xb   :  { %520 = vmatpush3.xpose.msk.msra.mxu0 %vm55_vm0, %v52_v2  ;;  %589 = vmatpush3.xpose.msk.msra.mxu1 %vm55_vm0, %v52_v2 }
   0xc   :  { %521 = vmatprep.subr.msk.mxu0 %vm55_vm0, %v51_v6  ;;  %574 = vmatprep.subr.msk.mxu1 %vm55_vm0, %v51_v6 }
   0xf   :  { %522 = vmatpush3.xpose.msk.msra.mxu0 %vm55_vm0, %v51_v6  ;;  %590 = vmatpush3.xpose.msk.msra.mxu1 %vm55_vm0, %v51_v6 }
  0x10   :  { %523 = vmatprep.subr.msk.mxu0 %vm55_vm0, %v50_v9  ;;  %575 = vmatprep.subr.msk.mxu1 %vm55_vm0, %v50_v9 }
  0x11   :  { %12 = vsyncpa [#allocation5], 0  ;;  %v318_v13 = vld [vmem:[%s936_s2 + $0x28] sm:$0xff]  ;;  %v317_v14 = vld [vmem:[%s936_s2 + $0x20] sm:$0xff] }
  0x12   :  { %v48_v15 = vld [vmem:[%s935_s1 + $0x48] sm:$0xff]  ;;  %346 = vperm.xlu1 %609, %v318_v13   ;;  %343 = vperm.xlu0 %608, %v317_v14   ;;  %v320_v16 = vld [vmem:[%s936_s2 + $0x38] sm:$0xff]  ;;  %v319_v17 = vld [vmem:[%s936_s2 + $0x30] sm:$0xff] }
  0x13   :  { %524 = vmatpush3.xpose.msk.msra.mxu0 %vm55_vm0, %v50_v9  ;;  %591 = vmatpush3.xpose.msk.msra.mxu1 %vm55_vm0, %v50_v9  ;;  %v47_v18 = vld [vmem:[%s935_s1 + $0x40] sm:$0xff]  ;;  %v322_v19 = vld [vmem:[%s936_s2 + $0x48] sm:$0xff]  ;;  %v46_v21 = vld [vmem:[%s935_s1 + $0x38] sm:$0xff] }
  0x14   :  { %525 = vmatprep.subr.msk.mxu0 %vm55_vm0, %v49_v12  ;;  %576 = vmatprep.subr.msk.mxu1 %vm55_vm0, %v49_v12  ;;  %v321_v20 = vld [vmem:[%s936_s2 + $0x40] sm:$0xff]  ;;  %v324_v22 = vld [vmem:[%s936_s2 + $0x58] sm:$0xff]  ;;  %v323_v23 = vld [vmem:[%s936_s2 + $0x50] sm:$0xff] }
  0x15   :  { %v45_v24 = vld [vmem:[%s935_s1 + $0x30] sm:$0xff]  ;;  %v326_v25 = vld [vmem:[%s936_s2 + $0x68] sm:$0xff]  ;;  %v325_v26 = vld [vmem:[%s936_s2 + $0x60] sm:$0xff] }
  0x16   :  { %352 = vperm.xlu1 %609, %v320_v16   ;;  %349 = vperm.xlu0 %608, %v319_v17   ;;  %v44_v27 = vld [vmem:[%s935_s1 + $0x28] sm:$0xff]  ;;  %v328_v28 = vld [vmem:[%s936_s2 + $0x78] sm:$0xff]  ;;  %v327_v29 = vld [vmem:[%s936_s2 + $0x70] sm:$0xff] }
  0x17   :  { %526 = vmatpush3.xpose.msk.msra.mxu0 %vm55_vm0, %v49_v12  ;;  %592 = vmatpush3.xpose.msk.msra.mxu1 %vm55_vm0, %v49_v12  ;;  %v43_v30 = vld [vmem:[%s935_s1 + $0x20] sm:$0xff]  ;;  %v42_v31 = vld [vmem:[%s935_s1 + $0x18] sm:$0xff]  ;;  %v41_v32 = vld [vmem:[%s935_s1 + $0x10] sm:$0xff] }
  0x18   :  { %527 = vmatprep.subr.msk.mxu0 %vm55_vm0, %v48_v15  ;;  %577 = vmatprep.subr.msk.mxu1 %vm55_vm0, %v48_v15  ;;  %v40_v33 = vld [vmem:[%s935_s1 + $0x8] sm:$0xff]  ;;  %v39_v34 = vld [vmem:[%s935_s1] sm:$0xff]  ;;  %v25_v37 = vld [vmem:[%s934_s0 + $0x10] sm:$0xff] }
  0x19   :  { %v24_v35 = vld [vmem:[%s934_s0 + $0x8] sm:$0xff]  ;;  %v33_v38 = vld [vmem:[%s934_s0 + $0x50] sm:$0xff]  ;;  %v26_v39 = vld [vmem:[%s934_s0 + $0x18] sm:$0xff] }
  0x1a   :  { %358 = vperm.xlu1 %609, %v322_v19   ;;  %355 = vperm.xlu0 %608, %v321_v20   ;;  %v32_v36 = vld [vmem:[%s934_s0 + $0x48] sm:$0xff]  ;;  %v34_v40 = vld [vmem:[%s934_s0 + $0x58] sm:$0xff]  ;;  %v27_v41 = vld [vmem:[%s934_s0 + $0x20] sm:$0xff] }
  0x1b   :  { %528 = vmatpush3.xpose.msk.msra.mxu0 %vm55_vm0, %v48_v15  ;;  %593 = vmatpush3.xpose.msk.msra.mxu1 %vm55_vm0, %v48_v15  ;;  %v35_v42 = vld [vmem:[%s934_s0 + $0x60] sm:$0xff]  ;;  %v28_v43 = vld [vmem:[%s934_s0 + $0x28] sm:$0xff]  ;;  %v29_v45 = vld [vmem:[%s934_s0 + $0x30] sm:$0xff] }
  0x1c   :  { %529 = vmatprep.subr.msk.mxu0 %vm55_vm0, %v47_v18  ;;  %578 = vmatprep.subr.msk.mxu1 %vm55_vm0, %v47_v18  ;;  %v36_v44 = vld [vmem:[%s934_s0 + $0x68] sm:$0xff]  ;;  %v37_v46 = vld [vmem:[%s934_s0 + $0x70] sm:$0xff]  ;;  %v30_v47 = vld [vmem:[%s934_s0 + $0x38] sm:$0xff] }
  0x1d   :  { %v38_v48 = vld [vmem:[%s934_s0 + $0x78] sm:$0xff]  ;;  %v482_v49 = vld [vmem:[%s937_s3] ss:$0 sm:$0xff]  ;;  %s655_s0 = smov [#allocation4]  }
  0x1e   :  { %364 = vperm.xlu1 %609, %v324_v22   ;;  %361 = vperm.xlu0 %608, %v323_v23   ;;  %s435_s3 = sshll.u32 %s655_s0, 4  ;;  %s436_s3 = int_to_ptr.vmem [resolvable:$true] %s435_s3 }
  0x1f   :  { %530 = vmatpush3.xpose.msk.msra.mxu0 %vm55_vm0, %v47_v18  ;;  %594 = vmatpush3.xpose.msk.msra.mxu1 %vm55_vm0, %v47_v18  ;;  %s610_s13 = scalar_lea.vmem %s436_s3, 512  ;;  %p615_p1 = scmp.lt.s32.totalorder %s436_s3, %s436_s3 }
  0x20   :  { %531 = vmatprep.subr.msk.mxu0 %vm55_vm0, %v46_v21  ;;  %579 = vmatprep.subr.msk.mxu1 %vm55_vm0, %v46_v21  ;;  %p611_p0 = scmp.ne.s32.totalorder %s436_s3, %s610_s13  ;;  %p616_p2 = scmp.lt.s32.totalorder %s610_s13, %s610_s13 }
  0x22   :  { %370 = vperm.xlu1 %609, %v326_v25   ;;  %367 = vperm.xlu0 %608, %v325_v26   ;;  %p617_p3 = por %p616_p2, %p615_p1 }
  0x23   :  { %532 = vmatpush3.xpose.msk.msra.mxu0 %vm55_vm0, %v46_v21  ;;  %595 = vmatpush3.xpose.msk.msra.mxu1 %vm55_vm0, %v46_v21 }
  0x24   :  { %533 = vmatprep.subr.msk.mxu0 %vm55_vm0, %v45_v24  ;;  %580 = vmatprep.subr.msk.mxu1 %vm55_vm0, %v45_v24  ;;  %p618_p4 = pnand %p617_p3, %p611_p0 }
  0x26   :  { %376 = vperm.xlu1 %609, %v328_v28   ;;  %373 = vperm.xlu0 %608, %v327_v29  }
  0x27   :  { %534 = vmatpush3.xpose.msk.msra.mxu0 %vm55_vm0, %v45_v24  ;;  %596 = vmatpush3.xpose.msk.msra.mxu1 %vm55_vm0, %v45_v24 }
  0x28   :  { %535 = vmatprep.subr.msk.mxu0 %vm55_vm0, %v44_v27  ;;  %581 = vmatprep.subr.msk.mxu1 %vm55_vm0, %v44_v27 }
  0x2b   :  { %536 = vmatpush3.xpose.msk.msra.mxu0 %vm55_vm0, %v44_v27  ;;  %597 = vmatpush3.xpose.msk.msra.mxu1 %vm55_vm0, %v44_v27 }
  0x2c   :  { %537 = vmatprep.subr.msk.mxu0 %vm55_vm0, %v43_v30  ;;  %582 = vmatprep.subr.msk.mxu1 %vm55_vm0, %v43_v30 }
  0x2f   :  { %538 = vmatpush3.xpose.msk.msra.mxu0 %vm55_vm0, %v43_v30  ;;  %598 = vmatpush3.xpose.msk.msra.mxu1 %vm55_vm0, %v43_v30 }
  0x30   :  { %539 = vmatprep.subr.msk.mxu0 %vm55_vm0, %v42_v31  ;;  %583 = vmatprep.subr.msk.mxu1 %vm55_vm0, %v42_v31 }
  0x33   :  { %540 = vmatpush3.xpose.msk.msra.mxu0 %vm55_vm0, %v42_v31  ;;  %599 = vmatpush3.xpose.msk.msra.mxu1 %vm55_vm0, %v42_v31 }
  0x34   :  { %541 = vmatprep.subr.msk.mxu0 %vm55_vm0, %v41_v32  ;;  %584 = vmatprep.subr.msk.mxu1 %vm55_vm0, %v41_v32 }
  0x37   :  { %542 = vmatpush3.xpose.msk.msra.mxu0 %vm55_vm0, %v41_v32  ;;  %600 = vmatpush3.xpose.msk.msra.mxu1 %vm55_vm0, %v41_v32 }
  0x38   :  { %543 = vmatprep.subr.msk.mxu0 %vm55_vm0, %v40_v33  ;;  %585 = vmatprep.subr.msk.mxu1 %vm55_vm0, %v40_v33 }
  0x3b   :  { %544 = vmatpush3.xpose.msk.msra.mxu0 %vm55_vm0, %v40_v33  ;;  %601 = vmatpush3.xpose.msk.msra.mxu1 %vm55_vm0, %v40_v33 }
  0x3c   :  { %545 = vmatprep.subr.msk.mxu0 %vm55_vm0, %v39_v34  ;;  %586 = vmatprep.subr.msk.mxu1 %vm55_vm0, %v39_v34 }
  0x3f   :  { %546 = vmatpush3.xpose.msk.msra.mxu0 %vm55_vm0, %v39_v34  ;;  %602 = vmatpush3.xpose.msk.msra.mxu1 %vm55_vm0, %v39_v34 }
  0x42   :  { %548 = vmatmul.mubr.msk.f32.vlgmr.msra.gmra.mxu0 %vm55_vm0, %v24_v35  ;;  %560 = vmatmul.mubr.msk.f32.vlgmr.msra.gmra.mxu1 %vm55_vm0, %v32_v36 }
  0x43   :  { %550 = vmatprep.mubr.msk.f32.mxu0 %vm55_vm0, %v25_v37  ;;  %562 = vmatprep.mubr.msk.f32.mxu1 %vm55_vm0, %v33_v38 }
  0x46   :  { %551 = vmatmul.mubr.msk.f32.gmra.mxu0 %vm55_vm0, %v26_v39  ;;  %563 = vmatmul.mubr.msk.f32.gmra.mxu1 %vm55_vm0, %v34_v40 }
  0x47   :  { %553 = vmatprep.mubr.msk.f32.mxu0 %vm55_vm0, %v27_v41  ;;  %565 = vmatprep.mubr.msk.f32.mxu1 %vm55_vm0, %v35_v42 }
  0x4a   :  { %554 = vmatmul.mubr.msk.f32.gmra.mxu0 %vm55_vm0, %v28_v43  ;;  %566 = vmatmul.mubr.msk.f32.gmra.mxu1 %vm55_vm0, %v36_v44 }
  0x4b   :  { %556 = vmatprep.mubr.msk.f32.mxu0 %vm55_vm0, %v29_v45  ;;  %568 = vmatprep.mubr.msk.f32.mxu1 %vm55_vm0, %v37_v46 }
  0x4e   :  { %557 = vmatmul.mubr.msk.f32.gmra.mxu0 %vm55_vm0, %v30_v47  ;;  %569 = vmatmul.mubr.msk.f32.gmra.mxu1 %vm55_vm0, %v38_v48 }
  0x81   :  { %v338_v50 = vpop.permute.xlu1 %337  ;;  %v332_v51 = vpop.permute.xlu0 %331 }
  0x82   :  { %vm384_vm1 = vcmp.eq.s32.totalorder %v338_v50, %v482_v49  ;;  %vm382_vm2 = vcmp.eq.s32.totalorder %v332_v51, %v482_v49 }
  0x85   :  { %v341_v52 = vpop.permute.xlu1 %340  ;;  %v335_v53 = vpop.permute.xlu0 %334 }
  0x86   :  { %vm385_vm3 = vcmp.eq.s32.totalorder %v341_v52, %v482_v49  ;;  %vm383_vm4 = vcmp.eq.s32.totalorder %v335_v53, %v482_v49 }
  0x87   :  { %vm399_vm5 = vmpackc.low %vm385_vm3, %vm384_vm1 }
  0x88   :  { %vm398_vm6 = vmpackc.low %vm383_vm4, %vm382_vm2 }
  0x89   :  { %vm400_vm7 = vmpackc.even %vm399_vm5, %vm398_vm6 }
  0x8a   :  { %v410_v56 = vsel %vm400_vm7, 16843009, %v654_v3 }
  0x8b   :  { %414 = vst [vmem:[#allocation4] sm:$0xff] %v410_v56 }
  0x8d   :  { %v347_v54 = vpop.permute.xlu1 %346  ;;  %v344_v55 = vpop.permute.xlu0 %343 }
  0x8e   :  { %vm387_vm8 = vcmp.eq.s32.totalorder %v347_v54, %v482_v49  ;;  %vm386_vm9 = vcmp.eq.s32.totalorder %v344_v55, %v482_v49 }
  0x8f   :  { %vm401_vm10 = vmpackc.low %vm387_vm8, %vm386_vm9 }
  0x91   :  { %v353_v57 = vpop.permute.xlu1 %352  ;;  %v350_v58 = vpop.permute.xlu0 %349 }
  0x92   :  { %vm389_vm11 = vcmp.eq.s32.totalorder %v353_v57, %v482_v49  ;;  %vm388_vm12 = vcmp.eq.s32.totalorder %v350_v58, %v482_v49 }
  0x93   :  { %vm402_vm13 = vmpackc.low %vm389_vm11, %vm388_vm12 }
  0x94   :  { %vm403_vm14 = vmpackc.even %vm402_vm13, %vm401_vm10 }
  0x95   :  { %v411_v59 = vsel %vm403_vm14, 16843009, %v654_v3  ;;  %v359_v60 = vpop.permute.xlu1 %358  ;;  %v356_v61 = vpop.permute.xlu0 %355 }
  0x96   :  { %415 = vst [vmem:[#allocation4 + $0x8] sm:$0xff] %v411_v59  ;;  %vm391_vm15 = vcmp.eq.s32.totalorder %v359_v60, %v482_v49  ;;  %vm390_vm0 = vcmp.eq.s32.totalorder %v356_v61, %v482_v49 }
  0x97   :  { %vm404_vm1 = vmpackc.low %vm391_vm15, %vm390_vm0 }
  0x99   :  { %v365_v62 = vpop.permute.xlu1 %364  ;;  %v362_v63 = vpop.permute.xlu0 %361 }
  0x9a   :  { %vm393_vm2 = vcmp.eq.s32.totalorder %v365_v62, %v482_v49  ;;  %vm392_vm3 = vcmp.eq.s32.totalorder %v362_v63, %v482_v49 }
  0x9b   :  { %vm405_vm4 = vmpackc.low %vm393_vm2, %vm392_vm3 }
  0x9c   :  { %vm406_vm5 = vmpackc.even %vm405_vm4, %vm404_vm1 }
  0x9d   :  { %v412_v0 = vsel %vm406_vm5, 16843009, %v654_v3  ;;  %v371_v1 = vpop.permute.xlu1 %370  ;;  %v368_v2 = vpop.permute.xlu0 %367 }
  0x9e   :  { %416 = vst [vmem:[#allocation4 + $0x10] sm:$0xff] %v412_v0  ;;  %vm395_vm6 = vcmp.eq.s32.totalorder %v371_v1, %v482_v49  ;;  %vm394_vm7 = vcmp.eq.s32.totalorder %v368_v2, %v482_v49 }
  0x9f   :  { %vm407_vm8 = vmpackc.low %vm395_vm6, %vm394_vm7 }
  0xa1   :  { %v377_v4 = vpop.permute.xlu1 %376  ;;  %v374_v5 = vpop.permute.xlu0 %373 }
  0xa2   :  { %vm397_vm9 = vcmp.eq.s32.totalorder %v377_v4, %v482_v49  ;;  %vm396_vm10 = vcmp.eq.s32.totalorder %v374_v5, %v482_v49 }
  0xa3   :  { %vm408_vm11 = vmpackc.low %vm397_vm9, %vm396_vm10 }
  0xa4   :  { %vm409_vm12 = vmpackc.even %vm408_vm11, %vm407_vm8 }
  0xa5   :  { %v413_v6 = vsel %vm409_vm12, 16843009, %v654_v3 }
  0xa6   :  { %417 = vst [vmem:[#allocation4 + $0x18] sm:$0xff] %v413_v6 }
  0xa7   :  { %621 = shalt.err (!%p618_p4)
}
  0xa8   :  { %s656_s1 = smov 128   ;;  %s657_s14 = smov 8  }
  0xa9   :  { %441 = dma.vmem_to_hbm [thread:$0]  %s436_s3, 512, %s939_s5, [#allocation5], %s656_s1, %s656_s1, %s657_s14  }
  0xaa   :  { %s658_s5 = smov [#allocation2]  }
  0xab   :  { %s423_s17 = sshll.u32 %s658_s5, 4  ;;  %s424_s17 = int_to_ptr.vmem [resolvable:$true] %s423_s17 }
  0xac   :  { %s630_s18 = scalar_lea.vmem %s424_s17, 2048  ;;  %p635_p6 = scmp.lt.s32.totalorder %s424_s17, %s424_s17 }
  0xad   :  { %p631_p5 = scmp.ne.s32.totalorder %s424_s17, %s630_s18  ;;  %p636_p7 = scmp.lt.s32.totalorder %s630_s18, %s630_s18 }
  0xaf   :  { %p637_p8 = por %p636_p7, %p635_p6 }
  0xb1   :  { %p638_p9 = pnand %p637_p8, %p631_p5 }
 0x102   :  { %v549_v7 = vpop.f32.mrf.mxu0  ;;  %v561_v8 = vpop.f32.mrf.mxu1 }
 0x103   :  { %298 = vst [vmem:[#allocation2 + $0x8] sm:$0xff] %v549_v7  ;;  %306 = vst [vmem:[#allocation2 + $0x48] sm:$0xff] %v561_v8 }
 0x104   :  { %v218_v3 = vpop.f32.mrf.mxu0  ;;  %v258_v9 = vpop.f32.mrf.mxu1 }
 0x105   :  { %297 = vst [vmem:[#allocation2] sm:$0xff] %v218_v3  ;;  %305 = vst [vmem:[#allocation2 + $0x40] sm:$0xff] %v258_v9 }
 0x106   :  { %v552_v10 = vpop.f32.mrf.mxu0  ;;  %v564_v11 = vpop.f32.mrf.mxu1 }
 0x107   :  { %300 = vst [vmem:[#allocation2 + $0x18] sm:$0xff] %v552_v10  ;;  %308 = vst [vmem:[#allocation2 + $0x58] sm:$0xff] %v564_v11 }
 0x108   :  { %v228_v12 = vpop.f32.mrf.mxu0  ;;  %v268_v13 = vpop.f32.mrf.mxu1 }
 0x109   :  { %299 = vst [vmem:[#allocation2 + $0x10] sm:$0xff] %v228_v12  ;;  %307 = vst [vmem:[#allocation2 + $0x50] sm:$0xff] %v268_v13 }
 0x10a   :  { %v555_v14 = vpop.f32.mrf.mxu0  ;;  %v567_v15 = vpop.f32.mrf.mxu1 }
 0x10b   :  { %302 = vst [vmem:[#allocation2 + $0x28] sm:$0xff] %v555_v14  ;;  %310 = vst [vmem:[#allocation2 + $0x68] sm:$0xff] %v567_v15 }
 0x10c   :  { %v238_v16 = vpop.f32.mrf.mxu0  ;;  %v278_v17 = vpop.f32.mrf.mxu1 }
 0x10d   :  { %301 = vst [vmem:[#allocation2 + $0x20] sm:$0xff] %v238_v16  ;;  %309 = vst [vmem:[#allocation2 + $0x60] sm:$0xff] %v278_v17 }
 0x10e   :  { %v558_v18 = vpop.f32.mrf.mxu0  ;;  %v570_v19 = vpop.f32.mrf.mxu1 }
 0x10f   :  { %304 = vst [vmem:[#allocation2 + $0x38] sm:$0xff] %v558_v18  ;;  %312 = vst [vmem:[#allocation2 + $0x78] sm:$0xff] %v570_v19 }
 0x110   :  { %v248_v20 = vpop.f32.mrf.mxu0  ;;  %v288_v21 = vpop.f32.mrf.mxu1 }
 0x111   :  { %303 = vst [vmem:[#allocation2 + $0x30] sm:$0xff] %v248_v20  ;;  %311 = vst [vmem:[#allocation2 + $0x70] sm:$0xff] %v288_v21 }
 0x112   :  { %641 = shalt.err (!%p638_p9)
}
 0x113   :  { %429 = dma.vmem_to_hbm [thread:$0]  %s424_s17, 2048, %s938_s4, [#allocation3], %s656_s1, %s656_s1, %s657_s14  }
 0x114   :  { %650 = dma.done.wait [#allocation3], 2048  }
 0x115   :  { %651 = vsyncadd [#allocation3], 4294965248 }
 0x116   :  { %652 = dma.done.wait [#allocation5], 512  }
 0x117   :  { %653 = vsyncadd [#allocation5], 4294966784 }
 0x118   :  { %448 = vsyncpa [#allocation3], 1 }
 0x119   :  { %449 = vsyncpa [#allocation5], 1 }

</bundles_post_ra>
